<compile_context>
chip_gen: v7x
topology: tpu7x:2x2x1
jax: 0.10.0
libtpu: 0.0.40
codegen_flags: <defaults>
</compile_context>

<pallas_src>
import functools

import jax
import jax.numpy as jnp
from jax.experimental import pallas as pl
from jax.experimental.pallas import tpu as pltpu

LANE = 128
WEIGHT = 10.0  # WeightedMSELoss(weight=10.0)


# --------------------------- block-size selection -------------------------- #
def _default_block_rows():
    """Biggest input tile whose 2-input x 2-buffer footprint fits the
    scoped-VMEM default of the current generation."""
    try:
        kind = jax.devices()[0].device_kind.lower()
    except Exception:
        return 2048
    if "v6" in kind or "v7" in kind:
        return 8192   # 2 x 2 x 4 MiB = 16 MiB  (32 MiB scoped default)
    if "v5" in kind:
        return 4096   # 2 x 2 x 2 MiB =  8 MiB  (v5e: 16 MiB scoped default)
    return 2048       # conservative for older / unknown generations


# ------------------------------ Pallas kernel ------------------------------ #
def _wmse_partial_kernel(pred_ref, targ_ref, out_ref, *, rows_total, block_rows,
                         blocks_per_core, first_masked_block):
    """Accumulate sum(((p - t) * w)^2) of this core's row-blocks into a resident
    (8, 128) output block.  `first_masked_block is None` => no block ever needs
    the element-validity mask."""
    c = pl.program_id(0)          # core-split axis ("parallel")
    i = pl.program_id(1)          # streaming axis ("arbitrary")
    blk = c * blocks_per_core + i  # global row-block id (may exceed the real count)

    @pl.when(i == 0)
    def _init():
        out_ref[...] = jnp.zeros(out_ref.shape, out_ref.dtype)

    fold_rows = (block_rows % 8) == 0

    def accumulate(apply_mask):
        p = pred_ref[...].astype(jnp.float32)
        t = targ_ref[...].astype(jnp.float32)
        w = jnp.where(t > jnp.float32(0.1), jnp.float32(WEIGHT), jnp.float32(1.0))
        d = (p - t) * w            # factored mask: one vmul per element
        if apply_mask:
            # Rows past rows_total (ragged last block) or whole duplicate blocks
            # (odd block count split over 2 cores) contribute exactly zero.
            gid = jax.lax.broadcasted_iota(jnp.int32, d.shape, 0) + blk * block_rows
            d = jnp.where(gid < rows_total, d, jnp.float32(0.0))
        sq = d * d
        if fold_rows:
            # Layout-free reshape + pure vreg-wise VPU add chain into the
            # single-vreg (8, 128) resident output block.
            out_ref[...] += sq.reshape(block_rows // 8, 8, LANE).sum(axis=0)
        else:
            # Tiny single-block case (rows not a multiple of 8).
            out_ref[0:1, :] += jnp.sum(sq, axis=0, keepdims=True)

    if first_masked_block is None:
        accumulate(False)
    else:
        @pl.when(blk < first_masked_block)
        def _unmasked():
            accumulate(False)

        @pl.when(blk >= first_masked_block)
        def _masked():
            accumulate(True)


# ------------------------------ host wrapper ------------------------------- #
def weighted_mse_loss(pred, target, *, block_rows=None):
    """mean((pred*m - target*m)^2) with m = 10 where target > 0.1 else 1."""
    assert pred.shape == target.shape
    n = int(pred.size)
    if n == 0:
        return jnp.float32(0.0)

    flat_p = pred.reshape(-1)
    flat_t = target.reshape(-1)

    tail = n % LANE
    main = n - tail
    rows = main // LANE

    # Lane tail (< 128 elements): computed in plain JAX (negligible) and added
    # to the kernel's partial sum.  This replaces the previous full-slab pad.
    if tail:
        tp = flat_p[main:].astype(jnp.float32)
        tt = flat_t[main:].astype(jnp.float32)
        tw = jnp.where(tt > jnp.float32(0.1), jnp.float32(WEIGHT), jnp.float32(1.0))
        td = (tp - tt) * tw
        tail_sum = jnp.sum(td * td)
    else:
        tail_sum = jnp.float32(0.0)

    if rows == 0:  # fewer than 128 elements: no kernel needed
        return tail_sum / jnp.float32(n)

    if tail:
        # TODO(synk): a manual-DMA path from an ANY-space 1-D ref would make the
        # ragged case fully zero-copy; XLA may materialize this prefix slice.
        p2d = flat_p[:main].reshape(rows, LANE)
        t2d = flat_t[:main].reshape(rows, LANE)
    else:
        p2d = flat_p.reshape(rows, LANE)   # layout-free reshape, no copy
        t2d = flat_t.reshape(rows, LANE)

    if block_rows is None:
        block_rows = _default_block_rows()

    if rows <= block_rows:
        br = rows                   # single block == full array dims (exempt from /8 rule)
        nbt = 1
    else:
        br = block_rows             # multiple of 8 by construction
        nbt = -(-rows // br)        # total real row-blocks

    nc = 2 if nbt >= 2 else 1       # 2-TensorCore split when there is enough work
    bpc = -(-nbt // nc)             # row-blocks per core (grid inner extent)
    last_ragged = (rows % br) != 0
    has_dup = nc * bpc > nbt        # core 1 may run duplicate (clamped) blocks

    if last_ragged or has_dup:
        first_masked_block = nbt - 1 if last_ragged else nbt
    else:
        first_masked_block = None

    if has_dup:
        def row_map(c, i):          # clamp so no DMA is fully out of bounds
            return (jnp.minimum(c * bpc + i, nbt - 1), 0)
    else:
        def row_map(c, i):
            return (c * bpc + i, 0)

    kernel = functools.partial(
        _wmse_partial_kernel,
        rows_total=rows,
        block_rows=br,
        blocks_per_core=bpc,
        first_masked_block=first_masked_block,
    )

    partials = pl.pallas_call(
        kernel,
        out_shape=jax.ShapeDtypeStruct((8 * nc, LANE), jnp.float32),
        grid_spec=pltpu.PrefetchScalarGridSpec(
            num_scalar_prefetch=0,
            grid=(nc, bpc),
            in_specs=[
                pl.BlockSpec((br, LANE), row_map),
                pl.BlockSpec((br, LANE), row_map),
            ],
            out_specs=pl.BlockSpec((8, LANE), lambda c, i: (c, 0)),
        ),
        compiler_params=pltpu.CompilerParams(
            dimension_semantics=("parallel", "arbitrary"),
        ),
    )(p2d, t2d)

    return (jnp.sum(partials) + tail_sum) / jnp.float32(n)


# ------------------------- synthetic prediction_func ----------------------- #
def make_prediction_func():
    """Deterministic recursive frame predictor: next frame = fixed convex
    combination of the last 3 frames.  Pure JAX glue (this is the 'model',
    external to the loss module)."""
    coeffs = jnp.array([0.2, 0.3, 0.5], dtype=jnp.float32)

    def prediction_func(inputs, num_label_frames):
        # inputs: (B, num_input_frames, H, W)
        frames = inputs.astype(jnp.float32)
        preds = []
        for _ in range(num_label_frames):
            last3 = frames[:, -3:, :, :]  # (B, 3, H, W)
            nxt = jnp.einsum("bfhw,f->bhw", last3, coeffs)[:, None, :, :]
            preds.append(nxt)
            frames = jnp.concatenate([frames, nxt], axis=1)
        return jnp.concatenate(preds, axis=1)  # (B, num_label_frames, H, W)

    return prediction_func


# -------------------------- RecursivePredictionLoss ------------------------ #
class RecursivePredictionLoss:
    def __init__(self, prediction_func, num_input_frames=10, num_label_frames=1):
        self.prediction_func = prediction_func
        self.num_input_frames = num_input_frames
        self.num_label_frames = num_label_frames

    def __call__(self, inputs, target):
        predicted_frames = self.prediction_func(inputs, self.num_label_frames)
        return weighted_mse_loss(predicted_frames, target)


def _ref_wmse(pred, target):
    mask = jnp.where(target > 0.1, WEIGHT, 1.0)
    return jnp.mean((pred * mask - target * mask) ** 2)


if __name__ == "__main__":
    key = jax.random.PRNGKey(0)
    k1, k2, k3, k4, k5, k6 = jax.random.split(key, 6)

    # --- module-level test (shapes consistent with the PyTorch spec) ------- #
    B, F_IN, F_LBL, H, W = 2, 10, 1, 32, 32
    inputs = jax.random.uniform(k1, (B, F_IN, H, W), dtype=jnp.float32)
    target = jax.random.uniform(k2, (B, F_LBL, H, W), dtype=jnp.float32)

    loss_mod = RecursivePredictionLoss(
        make_prediction_func(), num_input_frames=F_IN, num_label_frames=F_LBL
    )
    loss = jax.block_until_ready(loss_mod(inputs, target))

    pred_ref = make_prediction_func()(inputs, F_LBL)
    ref = _ref_wmse(pred_ref, target)
    assert jnp.allclose(loss, ref, rtol=1e-5, atol=1e-6), (loss, ref)

    # --- multi-block + 2-core split + ragged last block + dup + lane tail -- #
    big_p = jax.random.uniform(k3, (1, 1, 513, 513), dtype=jnp.float32)
    big_t = jax.random.uniform(k4, (1, 1, 513, 513), dtype=jnp.float32)
    big_loss = jax.block_until_ready(weighted_mse_loss(big_p, big_t, block_rows=512))
    big_ref = _ref_wmse(big_p, big_t)
    assert jnp.allclose(big_loss, big_ref, rtol=1e-4, atol=1e-6), (big_loss, big_ref)

    # --- clean multi-block 2-core split (no raggedness, no tail) ----------- #
    mid_p = jax.random.uniform(k5, (2, 1, 128, 128), dtype=jnp.float32)
    mid_t = jax.random.uniform(k6, (2, 1, 128, 128), dtype=jnp.float32)
    mid_loss = jax.block_until_ready(weighted_mse_loss(mid_p, mid_t, block_rows=64))
    mid_ref = _ref_wmse(mid_p, mid_t)
    assert jnp.allclose(mid_loss, mid_ref, rtol=1e-5, atol=1e-6), (mid_loss, mid_ref)

    # --- tiny (< 128 element) pure-JAX fallback path ------------------------ #
    small_p = jax.random.uniform(k1, (1, 1, 5, 5), dtype=jnp.float32)
    small_t = jax.random.uniform(k2, (1, 1, 5, 5), dtype=jnp.float32)
    small_loss = jax.block_until_ready(weighted_mse_loss(small_p, small_t))
    assert jnp.allclose(small_loss, _ref_wmse(small_p, small_t), rtol=1e-5, atol=1e-7)

    print("KERNEL_OK")
</pallas_src>

<mosaic_0001>
module attributes {stable_mosaic.version = 11 : i64} {
  func.func @_wmse_partial_kernel(%arg0: i32, %arg1: i32, %arg2: memref<16x128xf32, #tpu.memory_space<vmem>>, %arg3: memref<16x128xf32, #tpu.memory_space<vmem>>, %arg4: memref<8x128xf32, #tpu.memory_space<vmem>>) attributes {dimension_semantics = [#tpu.dimension_semantics<parallel>, #tpu.dimension_semantics<arbitrary>], iteration_bounds = array<i64: 1, 1>, scalar_prefetch = 0 : i64, scratch_operands = 0 : i64, tpu.core_type = #tpu.core_type<tc>, window_params = [{transform_indices = @transform_0, window_bounds = array<i64: 16, 128>}, {transform_indices = @transform_1, window_bounds = array<i64: 16, 128>}, {transform_indices = @transform_2, window_bounds = array<i64: 8, 128>}]} {
    %c0_i32 = arith.constant 0 : i32
    %0 = arith.cmpi eq, %arg1, %c0_i32 : i32
    %1 = arith.extui %0 : i1 to i32
    %c0_i32_0 = arith.constant 0 : i32
    %2 = arith.cmpi ne, %1, %c0_i32_0 : i32
    scf.if %2 {
      %cst_11 = arith.constant 0.000000e+00 : f32
      %18 = vector.broadcast %cst_11 : f32 to vector<8x128xf32>
      %c0_12 = arith.constant 0 : index
      %c0_13 = arith.constant 0 : index
      %19 = vector.load %arg4[%c0_12, %c0_13] : memref<8x128xf32, #tpu.memory_space<vmem>>, vector<8x128xf32>
      tpu.vector_store %arg4[%c0_12, %c0_13], %18 {strides = array<i32>} : memref<8x128xf32, #tpu.memory_space<vmem>>, vector<8x128xf32>,
    } else {
    }
    %c0 = arith.constant 0 : index
    %c0_1 = arith.constant 0 : index
    %3 = vector.load %arg2[%c0, %c0_1] : memref<16x128xf32, #tpu.memory_space<vmem>>, vector<16x128xf32>
    %c0_2 = arith.constant 0 : index
    %c0_3 = arith.constant 0 : index
    %4 = vector.load %arg3[%c0_2, %c0_3] : memref<16x128xf32, #tpu.memory_space<vmem>>, vector<16x128xf32>
    %cst = arith.constant 1.000000e-01 : f32
    %5 = vector.broadcast %cst : f32 to vector<16x128xf32>
    %6 = arith.cmpf ogt, %4, %5 : vector<16x128xf32>
    %cst_4 = arith.constant 1.000000e+01 : f32
    %cst_5 = arith.constant 1.000000e+00 : f32
    %7 = vector.broadcast %cst_4 : f32 to vector<16x128xf32>
    %8 = vector.broadcast %cst_5 : f32 to vector<16x128xf32>
    %9 = arith.select %6, %7, %8 : vector<16x128xi1>, vector<16x128xf32>
    %10 = arith.subf %3, %4 : vector<16x128xf32>
    %11 = arith.mulf %10, %9 : vector<16x128xf32>
    %12 = arith.mulf %11, %11 : vector<16x128xf32>
    %c0_6 = arith.constant 0 : index
    %c0_7 = arith.constant 0 : index
    %13 = vector.load %arg4[%c0_6, %c0_7] : memref<8x128xf32, #tpu.memory_space<vmem>>, vector<8x128xf32>
    %14 = vector.shape_cast %12 : vector<16x128xf32> to vector<2x8x128xf32>
    %cst_8 = arith.constant dense<0.000000e+00> : vector<8x128xf32>
    %15 = vector.multi_reduction <add>, %14, %cst_8 [0] : vector<2x8x128xf32> to vector<8x128xf32>
    %16 = arith.addf %13, %15 : vector<8x128xf32>
    %c0_9 = arith.constant 0 : index
    %c0_10 = arith.constant 0 : index
    %17 = vector.load %arg4[%c0_9, %c0_10] : memref<8x128xf32, #tpu.memory_space<vmem>>, vector<8x128xf32>
    tpu.vector_store %arg4[%c0_9, %c0_10], %16 {strides = array<i32>} : memref<8x128xf32, #tpu.memory_space<vmem>>, vector<8x128xf32>,
    return
  }
  func.func @transform_0(%arg0: i32, %arg1: i32) -> (i32, i32) {
    %c1_i32 = arith.constant 1 : i32
    %0 = arith.muli %arg0, %c1_i32 : i32
    %1 = arith.addi %0, %arg1 : i32
    %c0_i32 = arith.constant 0 : i32
    %c0_i32_0 = arith.constant 0 : i32
    return %1, %c0_i32 : i32, i32
  }
  func.func @transform_1(%arg0: i32, %arg1: i32) -> (i32, i32) {
    %c1_i32 = arith.constant 1 : i32
    %0 = arith.muli %arg0, %c1_i32 : i32
    %1 = arith.addi %0, %arg1 : i32
    %c0_i32 = arith.constant 0 : i32
    %c0_i32_0 = arith.constant 0 : i32
    return %1, %c0_i32 : i32, i32
  }
  func.func @transform_2(%arg0: i32, %arg1: i32) -> (i32, i32) {
    %c0_i32 = arith.constant 0 : i32
    %c0_i32_0 = arith.constant 0 : i32
    return %arg0, %c0_i32 : i32, i32
  }
}

</mosaic_0001>

<bundles_post_ra>
// kernel: tpu_custom_call.1
= control target key start
LH: loop header
LB: loop body
LE: loop exit
PB: predicated region body
PF: predicated region fallthrough
CT: control target
= control target key end

     0   :  { %7 = vsyncpa [#allocation3], 0  ;;  %s227_s0 = inlined_call_operand.hbm [shape: f32[16,128], index: 0, kind: input, shape index: {}]   ;;  %s228_s1 = inlined_call_operand.hbm [shape: f32[16,128], index: 1, kind: input, shape index: {}]   ;;  %s229_s2 = inlined_call_operand.hbm [shape: f32[8,128], index: 2, kind: output, shape index: {}]  }
   0x1   :  { %8 = vsyncpa [#allocation6], 0 }
   0x2   :  { %9 = vsyncpa [#allocation4], 0  ;;  %s170_s9 = smov [#allocation2]   ;;  %s98_s13 = scalar_lea.hbm %s227_s0, 256 }
   0x3   :  { %s19_s10 = sshll.u32 %s170_s9, 4  ;;  %p99_p0 = scmp.ne.s32.totalorder %s227_s0, %s98_s13  ;;  %s20_s10 = int_to_ptr.vmem [resolvable:$true] %s19_s10 }
   0x4   :  { %p102_p1 = scmp.lt.u32.totalorder %s98_s13, %s227_s0 }
   0x6   :  { %p104_p2 = pnand %p102_p1, %p99_p0 }
   0x8   :  { %107 = shalt.err (!%p104_p2)
}
   0x9   :  { %s108_s18 = scalar_lea.vmem %s20_s10, 256  ;;  %p113_p4 = scmp.lt.s32.totalorder %s20_s10, %s20_s10 }
   0xa   :  { %p109_p3 = scmp.ne.s32.totalorder %s20_s10, %s108_s18  ;;  %p114_p5 = scmp.lt.s32.totalorder %s108_s18, %s108_s18 }
   0xc   :  { %p115_p6 = por %p114_p5, %p113_p4 }
   0xe   :  { %p116_p7 = pnand %p115_p6, %p109_p3 }
  0x10   :  { %119 = shalt.err (!%p116_p7)
}
  0x11   :  { %s171_s19 = smov 128   ;;  %s172_s20 = smov 8  }
  0x12   :  { %25 = dma.hbm_to_vmem [thread:$0]  %s227_s0, 256, %s20_s10, [#allocation3], %s171_s19, %s171_s19, %s172_s20  }
  0x13   :  { %s173_s23 = smov [#allocation5]   ;;  %s120_s27 = scalar_lea.hbm %s228_s1, 256 }
  0x14   :  { %s35_s24 = sshll.u32 %s173_s23, 4  ;;  %p121_p8 = scmp.ne.s32.totalorder %s228_s1, %s120_s27  ;;  %s36_s24 = int_to_ptr.vmem [resolvable:$true] %s35_s24 }
  0x15   :  { %p124_p9 = scmp.lt.u32.totalorder %s120_s27, %s228_s1 }
  0x17   :  { %p126_p10 = pnand %p124_p9, %p121_p8 }
  0x19   :  { %129 = shalt.err (!%p126_p10)
}
  0x1a   :  { %s130_s4 = scalar_lea.vmem %s36_s24, 256  ;;  %p135_p12 = scmp.lt.s32.totalorder %s36_s24, %s36_s24 }
  0x1b   :  { %p131_p11 = scmp.ne.s32.totalorder %s36_s24, %s130_s4  ;;  %p136_p13 = scmp.lt.s32.totalorder %s130_s4, %s130_s4 }
  0x1d   :  { %p137_p0 = por %p136_p13, %p135_p12 }
  0x1f   :  { %p138_p1 = pnand %p137_p0, %p131_p11 }
  0x21   :  { %141 = shalt.err (!%p138_p1)
}
  0x22   :  { %41 = dma.hbm_to_vmem [thread:$0]  %s228_s1, 256, %s36_s24, [#allocation6], %s171_s19, %s171_s19, %s172_s20  }
  0x23   :  { %164 = dma.done.wait [#allocation3], 256  }
  0x24   :  { %165 = vsyncadd [#allocation3], 4294967040 }
  0x25   :  { %166 = dma.done.wait [#allocation6], 256  }
  0x26   :  { %167 = vsyncadd [#allocation6], 4294967040  ;;  %v57_v0 = vld [vmem:[#allocation2] sm:$0xff]  ;;  %v58_v1 = vld [vmem:[#allocation2 + $0x8] sm:$0xff]  ;;  %v174_v5 = vmov 1.0   ;;  %s175_s1 = smov [#allocation7]  }
  0x27   :  { %v59_v2 = vld [vmem:[#allocation5] sm:$0xff]  ;;  %v60_v3 = vld [vmem:[#allocation5 + $0x8] sm:$0xff]  ;;  %s81_s6 = sshll.u32 %s175_s1, 4  ;;  %s82_s6 = int_to_ptr.vmem [resolvable:$true] %s81_s6 }
  0x28   :  { %vm61_vm0 = vcmp.gt.f32.partialorder %v59_v2, 0.1  ;;  %v65_v4 = vsub.f32 %v57_v0, %v59_v2  ;;  %vm62_vm1 = vcmp.gt.f32.partialorder %v60_v3, 0.1  ;;  %v66_v7 = vsub.f32 %v58_v1, %v60_v3  ;;  %s142_s7 = scalar_lea.vmem %s82_s6, 128  ;;  %p147_p3 = scmp.lt.s32.totalorder %s82_s6, %s82_s6 }
  0x29   :  { %v63_v6 = vsel %vm61_vm0, 10.0, %v174_v5  ;;  %v64_v8 = vsel %vm62_vm1, 10.0, %v174_v5  ;;  %p143_p2 = scmp.ne.s32.totalorder %s82_s6, %s142_s7  ;;  %p148_p4 = scmp.lt.s32.totalorder %s142_s7, %s142_s7 }
  0x2a   :  { %v67_v9 = vmul.f32 %v65_v4, %v63_v6  ;;  %v68_v10 = vmul.f32 %v66_v7, %v64_v8 }
  0x2b   :  { %p149_p5 = por %p148_p4, %p147_p3 }
  0x2c   :  { %v69_v11 = vmul.f32 %v67_v9, %v67_v9  ;;  %v70_v12 = vmul.f32 %v68_v10, %v68_v10 }
  0x2d   :  { %p150_p6 = pnand %p149_p5, %p143_p2 }
  0x2e   :  { %v72_v13 = vadd.f32 %v70_v12, %v69_v11 }
  0x30   :  { %74 = vst [vmem:[#allocation7] sm:$0xff] %v72_v13 }
  0x31   :  { %153 = shalt.err (!%p150_p6)
}
  0x32   :  { %s154_s10 = scalar_lea.hbm %s229_s2, 128 }
  0x33   :  { %p155_p7 = scmp.ne.s32.totalorder %s229_s2, %s154_s10  ;;  %p158_p8 = scmp.lt.u32.totalorder %s154_s10, %s229_s2 }
  0x35   :  { %p160_p9 = pnand %p158_p8, %p155_p7 }
  0x37   :  { %163 = shalt.err (!%p160_p9)
}
  0x38   :  { %84 = dma.vmem_to_hbm [thread:$0]  %s82_s6, 128, %s229_s2, [#allocation4]  }
  0x39   :  { %168 = dma.done.wait [#allocation4], 128  }
  0x3a   :  { %169 = vsyncadd [#allocation4], 4294967168 }
  0x3b   :  { %88 = vsyncpa [#allocation3], 1 }
  0x3c   :  { %89 = vsyncpa [#allocation6], 1 }
  0x3d   :  { %90 = vsyncpa [#allocation4], 1 }

</bundles_post_ra>
